<compile_context>
chip_gen: v7x
topology: tpu7x:2x2x1
jax: 0.10.0
libtpu: 0.0.40
codegen_flags: <defaults>
</compile_context>

<pallas_src>
import functools

import jax
import jax.numpy as jnp
import numpy as np
from jax.experimental import pallas as pl
from jax.experimental.pallas import tpu as pltpu

MIN_SCORE = -1e9  # finite stand-in for the module-level MIN_SCORE constant


def _round_up(x: int, m: int) -> int:
    return ((x + m - 1) // m) * m


def _choose_batch_tile(B: int, S: int, D: int, Wp: int,
                       budget_bytes: int = 12 * 1024 * 1024) -> int:
    """Largest divisor of B whose per-step footprint fits a v7x-safe VMEM
    budget while keeping at least two grid steps (so both v7x TCs get work)."""
    def est(tb):
        io = 2 * 4 * tb * (3 * S * D + S + S * D + S * Wp)   # double-buffered blocks
        tmp = 4 * tb * (4 * S * S + 2 * S * Wp)              # in-kernel temporaries
        return io + tmp

    best = 1
    for tb in range(1, B + 1):
        if B % tb != 0:
            continue
        if est(tb) > budget_bytes:
            continue
        if B >= 2 and B // tb < 2:      # keep >= 2 grid steps for megacore
            continue
        best = tb
    return best


def _make_kernel(half: int, S: int, D: int, W: int, Wp: int, TB: int):
    NEG_INF = float("-inf")

    def kernel(q_ref, k_ref, v_ref, m_ref, out_ref, probs_ref):
        q = q_ref[...]                       # (TB, S, D) f32
        k = k_ref[...]                       # (TB, S, D) f32
        v = v_ref[...]                       # (TB, S, D) f32
        key_ok = m_ref[...] == 0             # (TB, 1, S) bool, True = attendable

        # ---- banded scores on the MXU (f32 accumulation, full precision) ---
        scores = jnp.einsum(
            "bqd,bkd->bqk", q, k,
            preferred_element_type=jnp.float32,
            precision=jax.lax.Precision.HIGHEST)            # (TB, S, S)

        iq = jax.lax.broadcasted_iota(jnp.int32, (S, S), 0)  # query index
        ik = jax.lax.broadcasted_iota(jnp.int32, (S, S), 1)  # key index
        diff = ik - iq
        in_band = jnp.logical_and(diff >= -half, diff <= half)   # (S, S)

        s = jnp.where(key_ok, scores, MIN_SCORE)             # masked keys -> MIN_SCORE
        s = jnp.where(in_band[None], s, NEG_INF)             # outside window -> -inf

        # ---- lane-dense softmax over the band -------------------------------
        row_max = jnp.max(s, axis=-1, keepdims=True)         # (TB, S, 1), finite
        e = jnp.exp(s - row_max)                             # 0 outside band

        # Out-of-range window slots carry MIN_SCORE in the reference softmax;
        # add their contribution analytically (n_oor slots per query row).
        col0 = jax.lax.broadcasted_iota(jnp.int32, (S, 1), 0)
        n_oor = (jnp.maximum(half - col0, 0)
                 + jnp.maximum(col0 + half - (S - 1), 0)).astype(jnp.float32)
        e_min = jnp.exp(MIN_SCORE - row_max)                 # (TB, S, 1)
        denom = jnp.sum(e, axis=-1, keepdims=True) + n_oor[None] * e_min

        inv = pl.reciprocal(denom, approx=True)              # EUP slot
        inv = inv * (2.0 - denom * inv)                      # 1 Newton step -> f32 exact

        p = e * inv                                          # (TB, S, S), 0 off-band
        p_oor = e_min * inv                                  # (TB, S, 1)

        # ---- weighted value sum on the MXU ----------------------------------
        out_ref[...] = jnp.einsum(
            "bqk,bkd->bqd", p, v,
            preferred_element_type=jnp.float32,
            precision=jax.lax.Precision.HIGHEST).astype(out_ref.dtype)

        # ---- extract the W-wide band into a lane-dense (TB, S, Wp) slab -----
        lane = jax.lax.broadcasted_iota(jnp.int32, (1, 1, Wp), 2)
        probs_pad = jnp.zeros((TB, S, Wp), jnp.float32)
        for w, o in enumerate(range(-half, half + 1)):
            diag = diff == o                                                  # (S, S)
            col = jnp.sum(jnp.where(diag[None], p, 0.0),
                          axis=-1, keepdims=True)                             # (TB, S, 1)
            in_range = jnp.logical_and(col0 + o >= 0, col0 + o < S)           # (S, 1)
            col = jnp.where(in_range[None], col, p_oor)
            probs_pad = probs_pad + jnp.where(lane == w, col, 0.0)
        probs_ref[...] = probs_pad.astype(probs_ref.dtype)

    return kernel


@functools.partial(jax.jit, static_argnames=("window_size",))
def local_attention(query, key, value, mask, window_size: int):
    """query/key/value: (*, S, D); mask: (*, S), nonzero == masked.

    Returns (new_value, probs) with the batch flattened to (-1, S, D) /
    (-1, S, W), matching the PyTorch module.
    """
    S, D = query.shape[-2:]
    q = query.reshape(-1, S, D).astype(jnp.float32)
    k = key.reshape(-1, S, D).astype(jnp.float32)
    v = value.reshape(-1, S, D).astype(jnp.float32)
    m = (mask.reshape(-1, S) != 0).astype(jnp.int32).reshape(-1, 1, S)
    B = q.shape[0]

    half = min(window_size // 2, S // 2)
    W = 2 * half + 1
    Wp = _round_up(W, 128)                  # lane-dense probs slab
    TB = _choose_batch_tile(B, S, D, Wp)
    kernel = _make_kernel(half, S, D, W, Wp, TB)

    out_shapes = (
        jax.ShapeDtypeStruct((B, S, D), jnp.float32),
        jax.ShapeDtypeStruct((B, S, Wp), jnp.float32),
    )
    new_value, probs_pad = pl.pallas_call(
        kernel,
        out_shape=out_shapes,
        grid=(B // TB,),
        in_specs=[
            pl.BlockSpec((TB, S, D), lambda b: (b, 0, 0)),
            pl.BlockSpec((TB, S, D), lambda b: (b, 0, 0)),
            pl.BlockSpec((TB, S, D), lambda b: (b, 0, 0)),
            pl.BlockSpec((TB, 1, S), lambda b: (b, 0, 0)),
        ],
        out_specs=(
            pl.BlockSpec((TB, S, D), lambda b: (b, 0, 0)),
            pl.BlockSpec((TB, S, Wp), lambda b: (b, 0, 0)),
        ),
        compiler_params=pltpu.CompilerParams(
            dimension_semantics=("parallel",)),
    )(q, k, v, m)
    return new_value, probs_pad[..., :W]


def _reference(q, k, v, mask, window_size):
    """NumPy mirror of the PyTorch forward (eval mode)."""
    q = np.asarray(q, np.float64)
    k = np.asarray(k, np.float64)
    v = np.asarray(v, np.float64)
    mask = np.asarray(mask)
    B, S, D = q.shape
    half = min(window_size // 2, S // 2)
    W = 2 * half + 1
    scores = np.full((B, S, W), MIN_SCORE, dtype=np.float64)
    for j, o in enumerate(range(-half, half + 1)):
        for i in range(S):
            ko = i + o
            if 0 <= ko < S:
                val = (q[:, i] * k[:, ko]).sum(-1)
                scores[:, i, j] = np.where(mask[:, ko] != 0, MIN_SCORE, val)
    smax = scores.max(-1, keepdims=True)
    e = np.exp(scores - smax)
    probs = e / e.sum(-1, keepdims=True)
    new_v = np.zeros((B, S, D), dtype=np.float64)
    for j, o in enumerate(range(-half, half + 1)):
        for i in range(S):
            ko = i + o
            if 0 <= ko < S:
                new_v[:, i] += probs[:, i, j:j + 1] * v[:, ko]
    return new_v, probs


if __name__ == "__main__":
    B, S, D = 2, 8, 32
    window_size = 5  # odd, as asserted by the module

    root = jax.random.PRNGKey(0)
    kq, kk, kv, km = jax.random.split(root, 4)
    query = jax.random.normal(kq, (B, S, D), jnp.float32)
    key = jax.random.normal(kk, (B, S, D), jnp.float32)
    value = jax.random.normal(kv, (B, S, D), jnp.float32)
    mask = (jax.random.uniform(km, (B, S)) < 0.25).astype(jnp.int32)
    # Force a fully-masked window (plus out-of-range slots) to exercise the
    # uniform-probability edge case of the reference softmax.
    mask = mask.at[0, :5].set(1)

    new_value, probs = local_attention(query, key, value, mask, window_size)
    jax.block_until_ready((new_value, probs))

    ref_v, ref_p = _reference(query, key, value, mask, window_size)
    np.testing.assert_allclose(np.asarray(probs), ref_p, rtol=1e-4, atol=1e-5)
    np.testing.assert_allclose(np.asarray(new_value), ref_v, rtol=1e-4, atol=1e-5)

    print("KERNEL_OK")
</pallas_src>

<mosaic_0001>
module attributes {stable_mosaic.version = 11 : i64} {
  func.func @kernel(%arg0: i32, %arg1: memref<1x8x32xf32, #tpu.memory_space<vmem>>, %arg2: memref<1x8x32xf32, #tpu.memory_space<vmem>>, %arg3: memref<1x8x32xf32, #tpu.memory_space<vmem>>, %arg4: memref<1x1x8xi32, #tpu.memory_space<vmem>>, %arg5: memref<1x8x32xf32, #tpu.memory_space<vmem>>, %arg6: memref<1x8x128xf32, #tpu.memory_space<vmem>>) attributes {dimension_semantics = [#tpu.dimension_semantics<parallel>], iteration_bounds = array<i64: 2>, scalar_prefetch = 0 : i64, scratch_operands = 0 : i64, tpu.core_type = #tpu.core_type<tc>, window_params = [{transform_indices = @transform_0, window_bounds = array<i64: 1, 8, 32>}, {transform_indices = @transform_1, window_bounds = array<i64: 1, 8, 32>}, {transform_indices = @transform_2, window_bounds = array<i64: 1, 8, 32>}, {transform_indices = @transform_3, window_bounds = array<i64: 1, 1, 8>}, {transform_indices = @transform_4, window_bounds = array<i64: 1, 8, 32>}, {transform_indices = @transform_5, window_bounds = array<i64: 1, 8, 128>}]} {
    %c0 = arith.constant 0 : index
    %c0_0 = arith.constant 0 : index
    %c0_1 = arith.constant 0 : index
    %0 = vector.load %arg1[%c0, %c0_0, %c0_1] : memref<1x8x32xf32, #tpu.memory_space<vmem>>, vector<1x8x32xf32>
    %c0_2 = arith.constant 0 : index
    %c0_3 = arith.constant 0 : index
    %c0_4 = arith.constant 0 : index
    %1 = vector.load %arg2[%c0_2, %c0_3, %c0_4] : memref<1x8x32xf32, #tpu.memory_space<vmem>>, vector<1x8x32xf32>
    %c0_5 = arith.constant 0 : index
    %c0_6 = arith.constant 0 : index
    %c0_7 = arith.constant 0 : index
    %2 = vector.load %arg3[%c0_5, %c0_6, %c0_7] : memref<1x8x32xf32, #tpu.memory_space<vmem>>, vector<1x8x32xf32>
    %c0_8 = arith.constant 0 : index
    %c0_9 = arith.constant 0 : index
    %c0_10 = arith.constant 0 : index
    %3 = vector.load %arg4[%c0_8, %c0_9, %c0_10] : memref<1x1x8xi32, #tpu.memory_space<vmem>>, vector<1x1x8xi32>
    %c0_i32 = arith.constant 0 : i32
    %4 = vector.broadcast %c0_i32 : i32 to vector<1x1x8xi32>
    %5 = arith.cmpi eq, %3, %4 : vector<1x1x8xi32>
    "tpu.trace_start"() <{level = 10 : i32, message = "bqd,bkd->bqk"}> : () -> ()
    %cst = arith.constant dense<0.000000e+00> : vector<1x8x8xf32>
    %6 = tpu.matmul %0, %1, %cst {dimension_numbers = #tpu.dot_dimension_numbers<[2], [2], [1], [1], [0, 0, 0, 1, 1, 1], [0], [0]>, precision = #tpu.contract_precision<fp32>} : vector<1x8x32xf32>, vector<1x8x32xf32>, vector<1x8x8xf32> -> vector<1x8x8xf32>
    "tpu.trace_stop"() : () -> ()
    %7 = tpu.iota {dimensions = array<i32: 0>} : vector<8x8xi32>
    %8 = tpu.iota {dimensions = array<i32: 1>} : vector<8x8xi32>
    %9 = arith.subi %8, %7 : vector<8x8xi32>
    %c-2_i32 = arith.constant -2 : i32
    %10 = vector.broadcast %c-2_i32 : i32 to vector<8x8xi32>
    %11 = arith.cmpi sge, %9, %10 : vector<8x8xi32>
    %c2_i32 = arith.constant 2 : i32
    %12 = vector.broadcast %c2_i32 : i32 to vector<8x8xi32>
    %13 = arith.cmpi sle, %9, %12 : vector<8x8xi32>
    %14 = arith.andi %11, %13 : vector<8x8xi1>
    %cst_11 = arith.constant -1.000000e+09 : f32
    %15 = vector.shape_cast %5 : vector<1x1x8xi1> to vector<1x1x8xi1>
    %16 = vector.broadcast %15 : vector<1x1x8xi1> to vector<1x8x8xi1>
    %17 = vector.broadcast %cst_11 : f32 to vector<1x8x8xf32>
    %18 = arith.select %16, %6, %17 : vector<1x8x8xi1>, vector<1x8x8xf32>
    %19 = vector.shape_cast %14 : vector<8x8xi1> to vector<1x8x8xi1>
    %cst_12 = arith.constant 0xFF800000 : f32
    %20 = vector.broadcast %cst_12 : f32 to vector<1x8x8xf32>
    %21 = arith.select %19, %18, %20 : vector<1x8x8xi1>, vector<1x8x8xf32>
    %cst_13 = arith.constant dense<0xFF800000> : vector<1x8xf32>
    %22 = vector.multi_reduction <maximumf>, %21, %cst_13 [2] : vector<1x8x8xf32> to vector<1x8xf32>
    %23 = vector.shape_cast %22 : vector<1x8xf32> to vector<1x8x1xf32>
    %24 = vector.broadcast %23 : vector<1x8x1xf32> to vector<1x8x8xf32>
    %25 = arith.subf %21, %24 : vector<1x8x8xf32>
    %26 = math.exp %25 : vector<1x8x8xf32>
    %27 = tpu.iota {dimensions = array<i32: 0>} : vector<8x1xi32>
    %c2_i32_14 = arith.constant 2 : i32
    %28 = vector.broadcast %c2_i32_14 : i32 to vector<8x1xi32>
    %29 = arith.subi %28, %27 : vector<8x1xi32>
    %c0_i32_15 = arith.constant 0 : i32
    %30 = vector.broadcast %c0_i32_15 : i32 to vector<8x1xi32>
    %31 = arith.maxsi %29, %30 : vector<8x1xi32>
    %c2_i32_16 = arith.constant 2 : i32
    %32 = vector.broadcast %c2_i32_16 : i32 to vector<8x1xi32>
    %33 = arith.addi %27, %32 : vector<8x1xi32>
    %c7_i32 = arith.constant 7 : i32
    %34 = vector.broadcast %c7_i32 : i32 to vector<8x1xi32>
    %35 = arith.subi %33, %34 : vector<8x1xi32>
    %c0_i32_17 = arith.constant 0 : i32
    %36 = vector.broadcast %c0_i32_17 : i32 to vector<8x1xi32>
    %37 = arith.maxsi %35, %36 : vector<8x1xi32>
    %38 = arith.addi %31, %37 : vector<8x1xi32>
    %39 = arith.sitofp %38 : vector<8x1xi32> to vector<8x1xf32>
    %cst_18 = arith.constant -1.000000e+09 : f32
    %40 = vector.broadcast %cst_18 : f32 to vector<1x8x1xf32>
    %41 = arith.subf %40, %23 : vector<1x8x1xf32>
    %42 = math.exp %41 : vector<1x8x1xf32>
    %cst_19 = arith.constant dense<0.000000e+00> : vector<1x8xf32>
    %43 = vector.multi_reduction <add>, %26, %cst_19 [2] : vector<1x8x8xf32> to vector<1x8xf32>
    %44 = vector.shape_cast %43 : vector<1x8xf32> to vector<1x8x1xf32>
    %45 = vector.shape_cast %39 : vector<8x1xf32> to vector<1x8x1xf32>
    %46 = arith.mulf %45, %42 : vector<1x8x1xf32>
    %47 = arith.addf %44, %46 : vector<1x8x1xf32>
    %48 = tpu.reciprocal %47 {approx = true} : vector<1x8x1xf32> -> vector<1x8x1xf32>
    %49 = arith.mulf %47, %48 : vector<1x8x1xf32>
    %cst_20 = arith.constant 2.000000e+00 : f32
    %50 = vector.broadcast %cst_20 : f32 to vector<1x8x1xf32>
    %51 = arith.subf %50, %49 : vector<1x8x1xf32>
    %52 = arith.mulf %48, %51 : vector<1x8x1xf32>
    %53 = vector.broadcast %52 : vector<1x8x1xf32> to vector<1x8x8xf32>
    %54 = arith.mulf %26, %53 : vector<1x8x8xf32>
    %55 = arith.mulf %42, %52 : vector<1x8x1xf32>
    "tpu.trace_start"() <{level = 10 : i32, message = "bqk,bkd->bqd"}> : () -> ()
    %cst_21 = arith.constant dense<0.000000e+00> : vector<1x8x32xf32>
    %56 = tpu.matmul %54, %2, %cst_21 {dimension_numbers = #tpu.dot_dimension_numbers<[2], [1], [1], [2], [0, 0, 0, 1, 1, 2], [0], [0]>, precision = #tpu.contract_precision<fp32>} : vector<1x8x8xf32>, vector<1x8x32xf32>, vector<1x8x32xf32> -> vector<1x8x32xf32>
    "tpu.trace_stop"() : () -> ()
    %c0_22 = arith.constant 0 : index
    %c0_23 = arith.constant 0 : index
    %c0_24 = arith.constant 0 : index
    %57 = vector.load %arg5[%c0_22, %c0_23, %c0_24] : memref<1x8x32xf32, #tpu.memory_space<vmem>>, vector<1x8x32xf32>
    tpu.vector_store %arg5[%c0_22, %c0_23, %c0_24], %56 {strides = array<i32>} : memref<1x8x32xf32, #tpu.memory_space<vmem>>, vector<1x8x32xf32>,
    %58 = tpu.iota {dimensions = array<i32: 2>} : vector<1x1x128xi32>
    %cst_25 = arith.constant 0.000000e+00 : f32
    %59 = vector.broadcast %cst_25 : f32 to vector<1x8x128xf32>
    %c-2_i32_26 = arith.constant -2 : i32
    %60 = vector.broadcast %c-2_i32_26 : i32 to vector<8x8xi32>
    %61 = arith.cmpi eq, %9, %60 : vector<8x8xi32>
    %62 = vector.shape_cast %61 : vector<8x8xi1> to vector<1x8x8xi1>
    %cst_27 = arith.constant 0.000000e+00 : f32
    %63 = vector.broadcast %cst_27 : f32 to vector<1x8x8xf32>
    %64 = arith.select %62, %54, %63 : vector<1x8x8xi1>, vector<1x8x8xf32>
    %cst_28 = arith.constant dense<0.000000e+00> : vector<1x8xf32>
    %65 = vector.multi_reduction <add>, %64, %cst_28 [2] : vector<1x8x8xf32> to vector<1x8xf32>
    %66 = vector.shape_cast %65 : vector<1x8xf32> to vector<1x8x1xf32>
    %c-2_i32_29 = arith.constant -2 : i32
    %67 = vector.broadcast %c-2_i32_29 : i32 to vector<8x1xi32>
    %68 = arith.addi %27, %67 : vector<8x1xi32>
    %c0_i32_30 = arith.constant 0 : i32
    %69 = vector.broadcast %c0_i32_30 : i32 to vector<8x1xi32>
    %70 = arith.cmpi sge, %68, %69 : vector<8x1xi32>
    %c-2_i32_31 = arith.constant -2 : i32
    %71 = vector.broadcast %c-2_i32_31 : i32 to vector<8x1xi32>
    %72 = arith.addi %27, %71 : vector<8x1xi32>
    %c8_i32 = arith.constant 8 : i32
    %73 = vector.broadcast %c8_i32 : i32 to vector<8x1xi32>
    %74 = arith.cmpi slt, %72, %73 : vector<8x1xi32>
    %75 = arith.andi %70, %74 : vector<8x1xi1>
    %76 = vector.shape_cast %75 : vector<8x1xi1> to vector<1x8x1xi1>
    %77 = arith.select %76, %66, %55 : vector<1x8x1xi1>, vector<1x8x1xf32>
    %c0_i32_32 = arith.constant 0 : i32
    %78 = vector.broadcast %c0_i32_32 : i32 to vector<1x1x128xi32>
    %79 = arith.cmpi eq, %58, %78 : vector<1x1x128xi32>
    %cst_33 = arith.constant 0.000000e+00 : f32
    %80 = vector.shape_cast %79 : vector<1x1x128xi1> to vector<1x1x128xi1>
    %81 = vector.broadcast %80 : vector<1x1x128xi1> to vector<1x8x128xi1>
    %82 = vector.shape_cast %77 : vector<1x8x1xf32> to vector<1x8x1xf32>
    %83 = vector.broadcast %82 : vector<1x8x1xf32> to vector<1x8x128xf32>
    %84 = vector.broadcast %cst_33 : f32 to vector<1x8x128xf32>
    %85 = arith.select %81, %83, %84 : vector<1x8x128xi1>, vector<1x8x128xf32>
    %86 = arith.addf %59, %85 : vector<1x8x128xf32>
    %c-1_i32 = arith.constant -1 : i32
    %87 = vector.broadcast %c-1_i32 : i32 to vector<8x8xi32>
    %88 = arith.cmpi eq, %9, %87 : vector<8x8xi32>
    %89 = vector.shape_cast %88 : vector<8x8xi1> to vector<1x8x8xi1>
    %cst_34 = arith.constant 0.000000e+00 : f32
    %90 = vector.broadcast %cst_34 : f32 to vector<1x8x8xf32>
    %91 = arith.select %89, %54, %90 : vector<1x8x8xi1>, vector<1x8x8xf32>
    %cst_35 = arith.constant dense<0.000000e+00> : vector<1x8xf32>
    %92 = vector.multi_reduction <add>, %91, %cst_35 [2] : vector<1x8x8xf32> to vector<1x8xf32>
    %93 = vector.shape_cast %92 : vector<1x8xf32> to vector<1x8x1xf32>
    %c-1_i32_36 = arith.constant -1 : i32
    %94 = vector.broadcast %c-1_i32_36 : i32 to vector<8x1xi32>
    %95 = arith.addi %27, %94 : vector<8x1xi32>
    %c0_i32_37 = arith.constant 0 : i32
    %96 = vector.broadcast %c0_i32_37 : i32 to vector<8x1xi32>
    %97 = arith.cmpi sge, %95, %96 : vector<8x1xi32>
    %c-1_i32_38 = arith.constant -1 : i32
    %98 = vector.broadcast %c-1_i32_38 : i32 to vector<8x1xi32>
    %99 = arith.addi %27, %98 : vector<8x1xi32>
    %c8_i32_39 = arith.constant 8 : i32
    %100 = vector.broadcast %c8_i32_39 : i32 to vector<8x1xi32>
    %101 = arith.cmpi slt, %99, %100 : vector<8x1xi32>
    %102 = arith.andi %97, %101 : vector<8x1xi1>
    %103 = vector.shape_cast %102 : vector<8x1xi1> to vector<1x8x1xi1>
    %104 = arith.select %103, %93, %55 : vector<1x8x1xi1>, vector<1x8x1xf32>
    %c1_i32 = arith.constant 1 : i32
    %105 = vector.broadcast %c1_i32 : i32 to vector<1x1x128xi32>
    %106 = arith.cmpi eq, %58, %105 : vector<1x1x128xi32>
    %cst_40 = arith.constant 0.000000e+00 : f32
    %107 = vector.shape_cast %106 : vector<1x1x128xi1> to vector<1x1x128xi1>
    %108 = vector.broadcast %107 : vector<1x1x128xi1> to vector<1x8x128xi1>
    %109 = vector.shape_cast %104 : vector<1x8x1xf32> to vector<1x8x1xf32>
    %110 = vector.broadcast %109 : vector<1x8x1xf32> to vector<1x8x128xf32>
    %111 = vector.broadcast %cst_40 : f32 to vector<1x8x128xf32>
    %112 = arith.select %108, %110, %111 : vector<1x8x128xi1>, vector<1x8x128xf32>
    %113 = arith.addf %86, %112 : vector<1x8x128xf32>
    %c0_i32_41 = arith.constant 0 : i32
    %114 = vector.broadcast %c0_i32_41 : i32 to vector<8x8xi32>
    %115 = arith.cmpi eq, %9, %114 : vector<8x8xi32>
    %116 = vector.shape_cast %115 : vector<8x8xi1> to vector<1x8x8xi1>
    %cst_42 = arith.constant 0.000000e+00 : f32
    %117 = vector.broadcast %cst_42 : f32 to vector<1x8x8xf32>
    %118 = arith.select %116, %54, %117 : vector<1x8x8xi1>, vector<1x8x8xf32>
    %cst_43 = arith.constant dense<0.000000e+00> : vector<1x8xf32>
    %119 = vector.multi_reduction <add>, %118, %cst_43 [2] : vector<1x8x8xf32> to vector<1x8xf32>
    %120 = vector.shape_cast %119 : vector<1x8xf32> to vector<1x8x1xf32>
    %c0_i32_44 = arith.constant 0 : i32
    %121 = vector.broadcast %c0_i32_44 : i32 to vector<8x1xi32>
    %122 = arith.addi %27, %121 : vector<8x1xi32>
    %c0_i32_45 = arith.constant 0 : i32
    %123 = vector.broadcast %c0_i32_45 : i32 to vector<8x1xi32>
    %124 = arith.cmpi sge, %122, %123 : vector<8x1xi32>
    %c0_i32_46 = arith.constant 0 : i32
    %125 = vector.broadcast %c0_i32_46 : i32 to vector<8x1xi32>
    %126 = arith.addi %27, %125 : vector<8x1xi32>
    %c8_i32_47 = arith.constant 8 : i32
    %127 = vector.broadcast %c8_i32_47 : i32 to vector<8x1xi32>
    %128 = arith.cmpi slt, %126, %127 : vector<8x1xi32>
    %129 = arith.andi %124, %128 : vector<8x1xi1>
    %130 = vector.shape_cast %129 : vector<8x1xi1> to vector<1x8x1xi1>
    %131 = arith.select %130, %120, %55 : vector<1x8x1xi1>, vector<1x8x1xf32>
    %c2_i32_48 = arith.constant 2 : i32
    %132 = vector.broadcast %c2_i32_48 : i32 to vector<1x1x128xi32>
    %133 = arith.cmpi eq, %58, %132 : vector<1x1x128xi32>
    %cst_49 = arith.constant 0.000000e+00 : f32
    %134 = vector.shape_cast %133 : vector<1x1x128xi1> to vector<1x1x128xi1>
    %135 = vector.broadcast %134 : vector<1x1x128xi1> to vector<1x8x128xi1>
    %136 = vector.shape_cast %131 : vector<1x8x1xf32> to vector<1x8x1xf32>
    %137 = vector.broadcast %136 : vector<1x8x1xf32> to vector<1x8x128xf32>
    %138 = vector.broadcast %cst_49 : f32 to vector<1x8x128xf32>
    %139 = arith.select %135, %137, %138 : vector<1x8x128xi1>, vector<1x8x128xf32>
    %140 = arith.addf %113, %139 : vector<1x8x128xf32>
    %c1_i32_50 = arith.constant 1 : i32
    %141 = vector.broadcast %c1_i32_50 : i32 to vector<8x8xi32>
    %142 = arith.cmpi eq, %9, %141 : vector<8x8xi32>
    %143 = vector.shape_cast %142 : vector<8x8xi1> to vector<1x8x8xi1>
    %cst_51 = arith.constant 0.000000e+00 : f32
    %144 = vector.broadcast %cst_51 : f32 to vector<1x8x8xf32>
    %145 = arith.select %143, %54, %144 : vector<1x8x8xi1>, vector<1x8x8xf32>
    %cst_52 = arith.constant dense<0.000000e+00> : vector<1x8xf32>
    %146 = vector.multi_reduction <add>, %145, %cst_52 [2] : vector<1x8x8xf32> to vector<1x8xf32>
    %147 = vector.shape_cast %146 : vector<1x8xf32> to vector<1x8x1xf32>
    %c1_i32_53 = arith.constant 1 : i32
    %148 = vector.broadcast %c1_i32_53 : i32 to vector<8x1xi32>
    %149 = arith.addi %27, %148 : vector<8x1xi32>
    %c0_i32_54 = arith.constant 0 : i32
    %150 = vector.broadcast %c0_i32_54 : i32 to vector<8x1xi32>
    %151 = arith.cmpi sge, %149, %150 : vector<8x1xi32>
    %c1_i32_55 = arith.constant 1 : i32
    %152 = vector.broadcast %c1_i32_55 : i32 to vector<8x1xi32>
    %153 = arith.addi %27, %152 : vector<8x1xi32>
    %c8_i32_56 = arith.constant 8 : i32
    %154 = vector.broadcast %c8_i32_56 : i32 to vector<8x1xi32>
    %155 = arith.cmpi slt, %153, %154 : vector<8x1xi32>
    %156 = arith.andi %151, %155 : vector<8x1xi1>
    %157 = vector.shape_cast %156 : vector<8x1xi1> to vector<1x8x1xi1>
    %158 = arith.select %157, %147, %55 : vector<1x8x1xi1>, vector<1x8x1xf32>
    %c3_i32 = arith.constant 3 : i32
    %159 = vector.broadcast %c3_i32 : i32 to vector<1x1x128xi32>
    %160 = arith.cmpi eq, %58, %159 : vector<1x1x128xi32>
    %cst_57 = arith.constant 0.000000e+00 : f32
    %161 = vector.shape_cast %160 : vector<1x1x128xi1> to vector<1x1x128xi1>
    %162 = vector.broadcast %161 : vector<1x1x128xi1> to vector<1x8x128xi1>
    %163 = vector.shape_cast %158 : vector<1x8x1xf32> to vector<1x8x1xf32>
    %164 = vector.broadcast %163 : vector<1x8x1xf32> to vector<1x8x128xf32>
    %165 = vector.broadcast %cst_57 : f32 to vector<1x8x128xf32>
    %166 = arith.select %162, %164, %165 : vector<1x8x128xi1>, vector<1x8x128xf32>
    %167 = arith.addf %140, %166 : vector<1x8x128xf32>
    %c2_i32_58 = arith.constant 2 : i32
    %168 = vector.broadcast %c2_i32_58 : i32 to vector<8x8xi32>
    %169 = arith.cmpi eq, %9, %168 : vector<8x8xi32>
    %170 = vector.shape_cast %169 : vector<8x8xi1> to vector<1x8x8xi1>
    %cst_59 = arith.constant 0.000000e+00 : f32
    %171 = vector.broadcast %cst_59 : f32 to vector<1x8x8xf32>
    %172 = arith.select %170, %54, %171 : vector<1x8x8xi1>, vector<1x8x8xf32>
    %cst_60 = arith.constant dense<0.000000e+00> : vector<1x8xf32>
    %173 = vector.multi_reduction <add>, %172, %cst_60 [2] : vector<1x8x8xf32> to vector<1x8xf32>
    %174 = vector.shape_cast %173 : vector<1x8xf32> to vector<1x8x1xf32>
    %c2_i32_61 = arith.constant 2 : i32
    %175 = vector.broadcast %c2_i32_61 : i32 to vector<8x1xi32>
    %176 = arith.addi %27, %175 : vector<8x1xi32>
    %c0_i32_62 = arith.constant 0 : i32
    %177 = vector.broadcast %c0_i32_62 : i32 to vector<8x1xi32>
    %178 = arith.cmpi sge, %176, %177 : vector<8x1xi32>
    %c2_i32_63 = arith.constant 2 : i32
    %179 = vector.broadcast %c2_i32_63 : i32 to vector<8x1xi32>
    %180 = arith.addi %27, %179 : vector<8x1xi32>
    %c8_i32_64 = arith.constant 8 : i32
    %181 = vector.broadcast %c8_i32_64 : i32 to vector<8x1xi32>
    %182 = arith.cmpi slt, %180, %181 : vector<8x1xi32>
    %183 = arith.andi %178, %182 : vector<8x1xi1>
    %184 = vector.shape_cast %183 : vector<8x1xi1> to vector<1x8x1xi1>
    %185 = arith.select %184, %174, %55 : vector<1x8x1xi1>, vector<1x8x1xf32>
    %c4_i32 = arith.constant 4 : i32
    %186 = vector.broadcast %c4_i32 : i32 to vector<1x1x128xi32>
    %187 = arith.cmpi eq, %58, %186 : vector<1x1x128xi32>
    %cst_65 = arith.constant 0.000000e+00 : f32
    %188 = vector.shape_cast %187 : vector<1x1x128xi1> to vector<1x1x128xi1>
    %189 = vector.broadcast %188 : vector<1x1x128xi1> to vector<1x8x128xi1>
    %190 = vector.shape_cast %185 : vector<1x8x1xf32> to vector<1x8x1xf32>
    %191 = vector.broadcast %190 : vector<1x8x1xf32> to vector<1x8x128xf32>
    %192 = vector.broadcast %cst_65 : f32 to vector<1x8x128xf32>
    %193 = arith.select %189, %191, %192 : vector<1x8x128xi1>, vector<1x8x128xf32>
    %194 = arith.addf %167, %193 : vector<1x8x128xf32>
    %c0_66 = arith.constant 0 : index
    %c0_67 = arith.constant 0 : index
    %c0_68 = arith.constant 0 : index
    %195 = vector.load %arg6[%c0_66, %c0_67, %c0_68] : memref<1x8x128xf32, #tpu.memory_space<vmem>>, vector<1x8x128xf32>
    tpu.vector_store %arg6[%c0_66, %c0_67, %c0_68], %194 {strides = array<i32>} : memref<1x8x128xf32, #tpu.memory_space<vmem>>, vector<1x8x128xf32>,
    return
  }
  func.func @transform_0(%arg0: i32) -> (i32, i32, i32) {
    %c0_i32 = arith.constant 0 : i32
    %c0_i32_0 = arith.constant 0 : i32
    %c0_i32_1 = arith.constant 0 : i32
    return %arg0, %c0_i32, %c0_i32_0 : i32, i32, i32
  }
  func.func @transform_1(%arg0: i32) -> (i32, i32, i32) {
    %c0_i32 = arith.constant 0 : i32
    %c0_i32_0 = arith.constant 0 : i32
    %c0_i32_1 = arith.constant 0 : i32
    return %arg0, %c0_i32, %c0_i32_0 : i32, i32, i32
  }
  func.func @transform_2(%arg0: i32) -> (i32, i32, i32) {
    %c0_i32 = arith.constant 0 : i32
    %c0_i32_0 = arith.constant 0 : i32
    %c0_i32_1 = arith.constant 0 : i32
    return %arg0, %c0_i32, %c0_i32_0 : i32, i32, i32
  }
  func.func @transform_3(%arg0: i32) -> (i32, i32, i32) {
    %c0_i32 = arith.constant 0 : i32
    %c0_i32_0 = arith.constant 0 : i32
    %c0_i32_1 = arith.constant 0 : i32
    return %arg0, %c0_i32, %c0_i32_0 : i32, i32, i32
  }
  func.func @transform_4(%arg0: i32) -> (i32, i32, i32) {
    %c0_i32 = arith.constant 0 : i32
    %c0_i32_0 = arith.constant 0 : i32
    %c0_i32_1 = arith.constant 0 : i32
    return %arg0, %c0_i32, %c0_i32_0 : i32, i32, i32
  }
  func.func @transform_5(%arg0: i32) -> (i32, i32, i32) {
    %c0_i32 = arith.constant 0 : i32
    %c0_i32_0 = arith.constant 0 : i32
    %c0_i32_1 = arith.constant 0 : i32
    return %arg0, %c0_i32, %c0_i32_0 : i32, i32, i32
  }
}

</mosaic_0001>

<bundles_post_ra>
// kernel: local_attention.1
= control target key start
LH: loop header
LB: loop body
LE: loop exit
PB: predicated region body
PF: predicated region fallthrough
CT: control target
= control target key end

     0   :  { %s2253_s0 = inlined_call_operand.hbm [shape: f32[2,8,32], index: 0, kind: input, shape index: {}]   ;;  %s2254_s1 = inlined_call_operand.hbm [shape: f32[2,8,32], index: 1, kind: input, shape index: {}]   ;;  %s2255_s2 = inlined_call_operand.hbm [shape: f32[2,8,32], index: 2, kind: input, shape index: {}]   ;;  %s2256_s3 = inlined_call_operand.vmem [shape: s32[2,1,8], index: 3, kind: input, shape index: {}]   ;;  %s2257_s4 = inlined_call_operand.hbm [shape: f32[2,8,32], index: 4, kind: output, shape index: {0}]   ;;  %s2258_s5 = inlined_call_operand.vmem [shape: f32[2,8,128], index: 5, kind: output, shape index: {1}]  }
   0x1   :  { %2264 = sst [smem:[#allocation14_spill]] %s2254_s1 }
   0x2   :  { %11 = vsyncpa [#allocation3], 0 }
   0x3   :  { %13 = vsyncpa [#allocation3 + $0x1], 0 }
   0x4   :  { %14 = vsyncpa [#allocation6], 0 }
   0x5   :  { %16 = vsyncpa [#allocation6 + $0x1], 0 }
   0x6   :  { %17 = vsyncpa [#allocation4], 0 }
   0x7   :  { %19 = vsyncpa [#allocation4 + $0x1], 0  ;;  %s1919_s18 = smov 0   ;;  %s1921_s19 = smov 0  }
   0x8   :  { %s1923_s20 = smov 0   ;;  %s1925_s21 = smov 0  }
   0x9 LB: > { %2265 = sst [smem:[#allocation12_spill]] %s1876_s20  ;;  %s1940_s22 = sadd.s32 4294967295, %s1880_s21   ;;  %s1880_s21 = sphi %s1925_s21, %s2286_s21   ;;  %s1876_s20 = sphi %s1923_s20, %s2283_s20   ;;  %s1872_s19 = sphi %s1921_s19, %s2285_s19   ;;  %s1868_s18 = sphi %s1919_s18, %s2284_s18  }
   0xa   : > { %s1531_s23 = sadd.s32 4294967294, %s1880_s21   ;;  %s1944_s24 = sadd.s32 1, %s1880_s21  }
   0xb   : > { %s32_s25 = sadd.s32 1, %s1876_s20  ;;  %s29_s26 = ssub.s32 %s1880_s21, %s1944_s24 }
   0xc   : > { %p39_p0 = scmp.ne.s32.totalorder %s1876_s20, %s1872_s19  ;;  %p30_p1 = scmp.eq.s32.totalorder %s29_s26, 0 }
   0xd   : > { %p40_p2 = scmp.eq.s32.totalorder %s1880_s21, 0  ;;  %p45_p3 = scmp.ne.s32.totalorder %s1872_s19, %s1868_s18 }
   0xe   : > { %p46_p4 = scmp.eq.s32.totalorder %s1940_s22, 0  ;;  %p147_p7 = scmp.eq.s32.totalorder %s1940_s22, 1 }
   0xf   : > { %s1956_s27 = scalar_select %p30_p1, %s1876_s20, %s32_s25  }
  0x10   : > { %p41_p5 = por %p40_p2, %p39_p0  ;;  %p1958_p6 = por %p46_p4, %p45_p3 }
  0x11   : > { %2266 = sst [smem:[#allocation13_spill]] %s1956_s27  ;;  %p153_p8 = scmp.eq.s32.totalorder %s1531_s23, 1 }
  0x12   : > { %s2267_s28 = scalar_select %p1958_p6, 1, 0 }
  0x13   : > { %p1677_p10 = scmp.lt.s32.totalorder %s1880_s21, 2  ;;  %p1965_p11 = por %p147_p7, %p39_p0 }
  0x14   : > { %p1969_p12 = por %p153_p8, %p45_p3  ;;  %s199_s6 = sand.u32 1, %s1876_s20  }
  0x15   : > { %s2268_s29 = scalar_select %p1965_p11, 1, 0 }
  0x16   : > { %s2269_s30 = scalar_select %p1969_p12, 1, 0 }
  0x17   : > { %s1975_s7 = sshll.u32 %s1880_s21, 7  ;;  %s1979_s8 = sshll.u32 %s199_s6, 3 }
  0x18   : > { %p1981_p13 = pnand %p1677_p10, %p41_p5  ;;  %s217_s10 = sand.u32 1, %s1880_s21  }
  0x19   : > { %s2271_s1 = sld [smem:[#allocation14_spill]]  ;;  %s221_s14 = scalar_lea.vmem [#allocation5], %s1979_s8 }
  0x1a   : > { %s2270_s9 = scalar_select %p1981_p13, 1, 0 }
  0x1b   : > { %s228_s15 = sshll.u32 %s221_s14, 4  ;;  %s1996_s16 = scalar_lea.sflag [#allocation6], %s217_s10  ;;  %s1993_s15 = int_to_ptr.vmem [resolvable:$true] %s228_s15 }
  0x1c   : > { %p2002_p2 = pneg %p1981_p13 }
  0x1f   : > { %s1990_s13 = scalar_lea.hbm %s2271_s1, %s1975_s7  ;;  %s1725_s11 = scalar_lea.hbm %s2271_s1, 256 }
  0x20   : > { %s1720_s17 = scalar_lea.hbm %s1990_s13, 128  ;;  %p1726_p5 = scmp.lt.u32.totalorder %s1990_s13, %s2271_s1 }
  0x21   : > { %p1721_p1 = scmp.ne.s32.totalorder %s1990_s13, %s1720_s17  ;;  %p1727_p7 = scmp.lt.u32.totalorder %s1725_s11, %s1720_s17 }
  0x22   : > { %p1729_p10 = scmp.lt.u32.totalorder %s1720_s17, %s1990_s13 }
  0x23   : > { %p1723_p3 = pnand %p2002_p2, %p1721_p1  ;;  %p1728_p8 = por %p1727_p7, %p1726_p5 }
  0x25   : > { %p1724_p4 = pneg %p1723_p3  ;;  %p1730_p9 = por %p1729_p10, %p1728_p8 }
  0x27   : > { %p1731_p0 = pnand %p1730_p9, %p1724_p4 }
  0x29   : > { %1734 = shalt.err (!%p1731_p0)
}
  0x2a   : > { %s1735_s10 = scalar_lea.vmem %s1993_s15, 128  ;;  %s1882_s25 = smov [#allocation5]  }
  0x2b   : > { %p1736_p1 = scmp.ne.s32.totalorder %s1993_s15, %s1735_s10  ;;  %s1740_s26 = sshll.u32 %s1882_s25, 4  ;;  %s1741_s26 = int_to_ptr.vmem [resolvable:$false] %s1740_s26 }
  0x2c   : > { %s1742_s12 = scalar_lea.vmem %s1741_s26, 256  ;;  %p1743_p11 = scmp.lt.s32.totalorder %s1993_s15, %s1741_s26 }
  0x2d   : > { %p1738_p3 = pnand %p1736_p1, %p2002_p2  ;;  %p1744_p6 = scmp.lt.s32.totalorder %s1742_s12, %s1735_s10 }
  0x2f   : > { %p1739_p12 = pneg %p1738_p3  ;;  %p1745_p5 = por %p1744_p6, %p1743_p11 }
  0x31   : > { %p1746_p7 = pnand %p1745_p5, %p1739_p12 }
  0x33   : > { %1749 = shalt.err (!%p1746_p7)
}
  0x34   : > { %1669 = dma.hbm_to_vmem [thread:$0]  (!%p1981_p13), %s1990_s13, 128, %s1993_s15, %s1996_s16  }
  0x35   : > { %p257_p9 = scmp.lt.s32.totalorder %s1880_s21, 3  ;;  %s2031_s14 = scalar_lea.hbm %s2253_s0, %s1975_s7 }
  0x36   : > { %p2273_p6 = scmp.ge.s32.totalorder %s1880_s21, 1  ;;  %s203_s25 = scalar_lea.vmem [#allocation2], %s1979_s8 }
  0x37   : > { %s210_s26 = sshll.u32 %s203_s25, 4  ;;  %s200_s13 = scalar_lea.sflag [#allocation3], %s199_s6  ;;  %s211_s26 = int_to_ptr.vmem [resolvable:$true] %s210_s26 }
  0x38   : > { %p2035_p11 = pnand %p2273_p6, %p257_p9  ;;  %s1750_s15 = scalar_lea.hbm %s2031_s14, 128 }
  0x39   : > { %p1751_p12 = scmp.ne.s32.totalorder %s2031_s14, %s1750_s15  ;;  %s1755_s11 = scalar_lea.hbm %s2253_s0, 256 }
  0x3a   : > { %s2274_s10 = scalar_select %p2035_p11, 1, 0 }
  0x3b   : > { %p1753_p0 = pnand %p1751_p12, %p2002_p2  ;;  %p1756_p8 = scmp.lt.u32.totalorder %s2031_s14, %s2253_s0 }
  0x3c   : > { %p1757_p10 = scmp.lt.u32.totalorder %s1755_s11, %s1750_s15  ;;  %p1759_p3 = scmp.lt.u32.totalorder %s1750_s15, %s2031_s14 }
  0x3d   : > { %p1754_p4 = pneg %p1753_p0 }
  0x3e   : > { %p1758_p1 = por %p1757_p10, %p1756_p8 }
  0x40   : > { %p1760_p5 = por %p1759_p3, %p1758_p1 }
  0x42   : > { %p1761_p7 = pnand %p1760_p5, %p1754_p4 }
  0x44   : > { %1764 = shalt.err (!%p1761_p7)
}
  0x45   : > { %s1765_s6 = scalar_lea.vmem %s211_s26, 128  ;;  %s1883_s25 = smov [#allocation2]  }
  0x46   : > { %p1766_p9 = scmp.ne.s32.totalorder %s211_s26, %s1765_s6  ;;  %s1770_s20 = sshll.u32 %s1883_s25, 4  ;;  %s1771_s20 = int_to_ptr.vmem [resolvable:$false] %s1770_s20 }
  0x47   : > { %s1772_s12 = scalar_lea.vmem %s1771_s20, 256  ;;  %p1773_p0 = scmp.lt.s32.totalorder %s211_s26, %s1771_s20 }
  0x48   : > { %p1768_p6 = pnand %p1766_p9, %p2002_p2  ;;  %p1774_p11 = scmp.lt.s32.totalorder %s1772_s12, %s1765_s6 }
  0x4a   : > { %p1769_p12 = pneg %p1768_p6  ;;  %p1775_p13 = por %p1774_p11, %p1773_p0 }
  0x4c   : > { %p1776_p8 = pnand %p1775_p13, %p1769_p12 }
  0x4e   : > { %1779 = shalt.err (!%p1776_p8)
}
  0x4f   : > { %p2275_p10 = scmp.ne.s32.totalorder %s2270_s9, 0  ;;  %s2063_s15 = scalar_lea.hbm %s2255_s2, %s1975_s7 }
  0x50   : > { %s239_s20 = scalar_lea.vmem [#allocation7], %s1979_s8  ;;  %s1780_s11 = scalar_lea.hbm %s2063_s15, 128 }
  0x51   : > { %1666 = dma.hbm_to_vmem [thread:$0]  (!%p2275_p10), %s2031_s14, 128, %s211_s26, %s200_s13  }
  0x52   : > { %s246_s17 = sshll.u32 %s239_s20, 4  ;;  %p1781_p13 = scmp.ne.s32.totalorder %s2063_s15, %s1780_s11  ;;  %s247_s17 = int_to_ptr.vmem [resolvable:$true] %s246_s17 }
  0x53   : > { %s1785_s14 = scalar_lea.hbm %s2255_s2, 256  ;;  %p1786_p1 = scmp.lt.u32.totalorder %s2063_s15, %s2255_s2 }
  0x54   : > { %p1783_p11 = pnand %p1781_p13, %p2002_p2  ;;  %p1787_p3 = scmp.lt.u32.totalorder %s1785_s14, %s1780_s11 }
  0x55   : > { %p1789_p7 = scmp.lt.u32.totalorder %s1780_s11, %s2063_s15 }
  0x56   : > { %p1784_p4 = pneg %p1783_p11  ;;  %p1788_p5 = por %p1787_p3, %p1786_p1 }
  0x58   : > { %p1790_p9 = por %p1789_p7, %p1788_p5 }
  0x5a   : > { %p1791_p6 = pnand %p1790_p9, %p1784_p4 }
  0x5c   : > { %1794 = shalt.err (!%p1791_p6)
}
  0x5d   : > { %s1795_s7 = scalar_lea.vmem %s247_s17, 128  ;;  %s1884_s8 = smov [#allocation7]  }
  0x5e   : > { %p1796_p12 = scmp.ne.s32.totalorder %s247_s17, %s1795_s7  ;;  %s1800_s12 = sshll.u32 %s1884_s8, 4  ;;  %s1801_s12 = int_to_ptr.vmem [resolvable:$false] %s1800_s12 }
  0x5f   : > { %s1802_s1 = scalar_lea.vmem %s1801_s12, 256  ;;  %p1803_p13 = scmp.lt.s32.totalorder %s247_s17, %s1801_s12 }
  0x60   : > { %p1798_p0 = pnand %p1796_p12, %p2002_p2  ;;  %p1804_p11 = scmp.lt.s32.totalorder %s1802_s1, %s1795_s7 }
  0x62   : > { %p1799_p8 = pneg %p1798_p0  ;;  %p1805_p10 = por %p1804_p11, %p1803_p13 }
  0x64   : > { %p1806_p1 = pnand %p1805_p10, %p1799_p8 }
  0x66   : > { %1809 = shalt.err (!%p1806_p1)
}
  0x67   : > { %p2276_p3 = scmp.ne.s32.totalorder %s2270_s9, 0  ;;  %p2277_p4 = scmp.ne.s32.totalorder %s2274_s10, 0 }
  0x68   : > { %s2087_s23 = sand.u32 (!%p2277_p4), 1, %s1872_s19   ;;  %p2278_p2 = scmp.ne.s32.totalorder (!%p2277_p4), %s2267_s28, 0 }
  0x69   : > { %1672 = dma.hbm_to_vmem [thread:$0]  (!%p2276_p3), %s2063_s15, 128, %s247_s17, %s1996_s16  }
  0x6a   : > { %261 = sbr.rel (%p2277_p4) target bundleno = 983 (0x3d7), region = 36  ;;  %s2090_s27 = sshll.u32 (!%p2277_p4), %s2087_s23, 3 }
  0x6b   : > { %s264_s20 = scalar_lea.sflag (!%p2277_p4), [#allocation3], %s2087_s23  ;;  %s267_s11 = scalar_lea.vmem (!%p2277_p4), [#allocation2], %s2090_s27 }
  0x71   : > { %1855 = dma.done.wait (%p2278_p2), %s264_s20, 128  }
  0x72   : > { %1857 = vsyncadd (%p2278_p2), %s264_s20, 4294967168  ;;  %s272_s9 = sand.u32 1, %s1940_s22   ;;  %s276_s10 = scalar_lea.vmem [#allocation5], %s2090_s27 }
  0x73   : > { %s273_s16 = scalar_lea.sflag [#allocation6], %s272_s9 }
  0x74   : > { %1859 = dma.done.wait (%p2278_p2), %s273_s16, 256  }
  0x75   : > { %1861 = vsyncadd (%p2278_p2), %s273_s16, 4294967040  ;;  %v1885_v0 = vmov 0.0   ;;  %vm1886_vm0 = vmmov 0   ;;  %vm341_vm1 = vcmask 261120   ;;  %v337_v1 = vld [vmem:[%s276_s10] sm:$0xff]  ;;  %v336_v2 = vld [vmem:[%s267_s11] sm:$0xff]  ;;  %v794_v15 = vlaneseq }
  0x76   : > { %1575 = vmatprep.subr.mxu0 %v1885_v0  ;;  %1577 = vmatprep.mubr.msk.f32.mxu0 %vm1886_vm0, %v1885_v0  ;;  %v346_v3 = vsel %vm341_vm1, %v337_v1, 0  ;;  %v343_v4 = vsel %vm341_vm1, %v336_v2, 0  ;;  %p329_p10 = scmp.lt.s32.totalorder %s1940_s22, 1  ;;  %v1887_v20 = vmov 0   ;;  %vm810_vm7 = vcmask 64512   ;;  %s285_s25 = scalar_lea.vmem [#allocation7], %s2090_s27 }
  0x77   : > { %1605 = vmatprep.subr.mxu1 %v1885_v0  ;;  %1607 = vmatprep.mubr.msk.f32.mxu1 %vm1886_vm0, %v1885_v0  ;;  %v349_v5 = vand.u32 4294901760, %v346_v3  ;;  %v414_v6 = vand.u32 4294901760, %v343_v4  ;;  %v2135_v17 = vshrl.u32 %v794_v15, 7  ;;  %v2137_v18 = vand.u32 127, %v794_v15  ;;  %v338_v34 = vld [vmem:[%s285_s25] sm:$0xff]  ;;  %s1548_s8 = sshll.u32 %s1940_s22, 7 }
  0x78   : > { %s2129_s28 = scalar_select %p329_p10, %s1940_s22, 1  ;;  %v2149_v35 = vand.u32 4294901760, %v338_v34 }
  0x79   : > { %1576 = vmatpush3.xpose.msra.mxu0 %v349_v5  ;;  %v426_v7 = vsub.f32 %v346_v3, %v349_v5  ;;  %v415_v8 = vsub.f32 %v343_v4, %v414_v6  ;;  %v805_v19 = vsub.s32 0, %v2135_v17  ;;  %v2142_v22 = vsub.s32 %v2137_v18, %v2135_v17  ;;  %s322_s12 = scalar_lea.vmem [#allocation8], %s2090_s27  ;;  %s2208_s9 = scalar_lea.hbm %s2257_s4, %s1548_s8 }
  0x7a   : > { %1580 = vmatprep.subr.mxu0 %v1885_v0  ;;  %s331_s6 = scalar_lea.vmem %s2256_s3, %s2129_s28  ;;  %1606 = vmatpush3.msra.mxu1 %v2149_v35  ;;  %v2154_v36 = vadd.s32 2, %v2135_v17  ;;  %v817_v38 = vsub.s32 2, %v2135_v17  ;;  %v921_v54 = vsub.f32 %v338_v34, %v2149_v35  ;;  %s1545_s14 = sshll.u32 %s2129_s28, 3 }
  0x7b   : > { %v416_v9 = vand.u32 4294901760, %v415_v8  ;;  %v427_v10 = vand.u32 4294901760, %v426_v7  ;;  %v339_v16 = vld [vmem:[%s331_s6] sm:$0x1]  ;;  %vm799_vm3 = vcmp.ge.s32.totalorder %v2142_v22, 4294967294  ;;  %vm800_vm4 = vcmp.le.s32.totalorder %v2142_v22, 2  ;;  %1610 = vmatprep.subr.mxu1 %v1885_v0  ;;  %s335_s7 = scalar_lea.vmem %s2258_s5, %s1545_s14 }
  0x7c   : > { %vm340_vm2 = vcmp.eq.s32.totalorder %v339_v16, 0  ;;  %vm801_vm6 = vmand %vm799_vm3, %vm800_vm4  ;;  %v1546_v39 = vadd.s32 4294967289, %v2154_v36  ;;  %vm818_vm8 = vcmp.gt.s32.totalorder %v817_v38, 0  ;;  %vm1320_vm10 = vcmp.eq.s32.totalorder %v2142_v22, 0  ;;  %s1382_s1 = sshll.u32 %s322_s12, 4  ;;  %s1365_s16 = scalar_lea.sflag [#allocation4], %s2087_s23  ;;  %s2210_s1 = int_to_ptr.vmem [resolvable:$true] %s1382_s1 }
  0x7d   : > { %v417_v11 = vsub.f32 %v415_v8, %v416_v9  ;;  %v428_v12 = vsub.f32 %v426_v7, %v427_v10  ;;  %v802_v21 = vsel %vm340_vm2, 1, %v1887_v20  ;;  %v819_v41 = vsel %vm818_vm8, %v817_v38, 0  ;;  %s1810_s10 = scalar_lea.vmem %s2210_s1, 128  ;;  %p2279_p7 = scmp.ne.s32.totalorder %s2268_s29, 0 }
  0x7e   : > { %v806_v23 = vrot.slane %v802_v21, %v805_v19  ;;  %vm822_vm9 = vcmp.gt.s32.totalorder %v1546_v39, 0  ;;  %vm1290_vm11 = vcmp.eq.s32.totalorder %v2142_v22, 4294967294  ;;  %vm1349_vm12 = vcmp.eq.s32.totalorder %v2142_v22, 2  ;;  %p1811_p5 = scmp.ne.s32.totalorder %s2210_s1, %s1810_s10  ;;  %s1888_s22 = smov [#allocation8]  }
  0x7f   : > { %v418_v13 = vand.u32 4294901760, %v417_v11  ;;  %v429_v14 = vand.u32 4294901760, %v428_v12  ;;  %v823_v42 = vsel %vm822_vm9, %v1546_v39, 0  ;;  %vm1305_vm13 = vcmp.eq.s32.totalorder %v2142_v22, 4294967295  ;;  %s1814_s27 = sshll.u32 %s1888_s22, 4  ;;  %s1815_s27 = int_to_ptr.vmem [resolvable:$false] %s1814_s27 }
  0x80   : > { %vm807_vm5 = vcmp.eq.s32.totalorder %v806_v23, 1  ;;  %v824_v43 = vadd.s32 %v823_v42, %v819_v41  ;;  %v922_v62 = vand.u32 4294901760, %v921_v54  ;;  %vm1334_vm14 = vcmp.eq.s32.totalorder %v2142_v22, 1  ;;  %p1812_p9 = pnand %p1811_p5, %p2279_p7  ;;  %s1816_s28 = scalar_lea.vmem %s1815_s27, 256 }
  0x81   : > { %1578 = vmatmul.mubr.f32.vlgmr.msra.gmra.mrb[0].mxu0 %v418_v13  ;;  %v1295_v11 = vadd.s32 4294967294, %v2135_v17  ;;  %v1310_v12 = vadd.s32 4294967295, %v2135_v17  ;;  %v1339_v16 = vadd.s32 1, %v2135_v17  ;;  %vm1300_vm3 = vcmp.eq.s32.totalorder %v2137_v18, 0  ;;  %p1817_p12 = scmp.lt.s32.totalorder %s2210_s1, %s1815_s27  ;;  %p1818_p0 = scmp.lt.s32.totalorder %s1816_s28, %s1810_s10 }
  0x82   : > { %1581 = vmatpush3.xpose.msra.mxu0 %v429_v14  ;;  %1582 = vmatprep.mubr.msk.f32.mxu0 %vm1886_vm0, %v1885_v0  ;;  %v825_v44 = vcvt.s32.f32 %v824_v43  ;;  %vm1315_vm4 = vcmp.eq.s32.totalorder %v2137_v18, 1  ;;  %vm1358_vm8 = vcmp.eq.s32.totalorder %v2137_v18, 4  ;;  %p1813_p6 = pneg %p1812_p9 }
  0x83   : > { %1585 = vmatprep.subr.mxu0 %v1885_v0  ;;  %vm1296_vm15 = vcmp.ge.s32.totalorder %v1295_v11, 0  ;;  %vm1311_vm2 = vcmp.ge.s32.totalorder %v1310_v12, 0  ;;  %p1819_p8 = por %p1818_p0, %p1817_p12 }
  0x85   : > { %p1820_p13 = pnand %p1819_p8, %p1813_p6 }
  0x89   : > { %1583 = vmatmul.mubr.f32.vlgmr.msra.gmra.mrb[0].mxu0 %v414_v6 }
  0x8a   : > { %1586 = vmatpush3.xpose.msra.mxu0 %v426_v7  ;;  %1587 = vmatprep.mubr.msk.f32.mxu0 %vm1886_vm0, %v1885_v0 }
  0x8b   : > { %1590 = vmatprep.subr.mxu0 %v1885_v0 }
  0x91   : > { %1588 = vmatmul.mubr.f32.vlgmr.msra.gmra.mrb[0].mxu0 %v415_v8 }
  0x92   : > { %1591 = vmatpush3.xpose.msra.mxu0 %v349_v5  ;;  %1592 = vmatprep.mubr.msk.f32.mxu0 %vm1886_vm0, %v1885_v0 }
  0x93   : > { %1595 = vmatprep.subr.mxu0 %v1885_v0 }
  0x99   : > { %1593 = vmatmul.mubr.f32.vlgmr.msra.gmra.mrb[0].mxu0 %v416_v9 }
  0x9a   : > { %1596 = vmatpush3.xpose.msra.mxu0 %v427_v10  ;;  %1597 = vmatprep.mubr.msk.f32.mxu0 %vm1886_vm0, %v1885_v0 }
  0x9b   : > { %1600 = vmatprep.subr.mxu0 %v1885_v0 }
  0xa1   : > { %1598 = vmatmul.mubr.f32.vlgmr.msra.gmra.mrb[0].mxu0 %v414_v6 }
  0xa2   : > { %1601 = vmatpush3.xpose.msra.mxu0 %v349_v5  ;;  %1602 = vmatprep.mubr.msk.f32.mxu0 %vm1886_vm0, %v1885_v0  ;;  %v923_v5 = vsub.f32 %v921_v54, %v922_v62 }
  0xa4   : > { %v924_v9 = vand.u32 4294901760, %v923_v5 }
  0xa9   : > { %1603 = vmatmul.mubr.f32.vlgmr.msra.gmra.mrb[0].mxu0 %v414_v6 }
 0x17c   : > { %v790_v24 = vpop.f32.mrb[0].mxu0 }
 0x17d   : > { %v808_v25 = vsel %vm807_vm5, %v790_v24, -1e+09  ;;  %v1604_v26 = vpop.f32.mrb[1].mxu0  ;;  %vm1355_vm5 = vcmp.lt.s32.totalorder %v2154_v36, 8 }
 0x17e   : > { %v809_v27 = vsel %vm801_vm6, %v808_v25, -inf  ;;  %vm1341_vm6 = vcmp.lt.s32.totalorder %v1339_v16, 8 }
 0x17f   : > { %v811_v28 = vsel %vm810_vm7, %v809_v27, -inf }
 0x180   : > { %812 = vmax.xlane.f32.xlu0 %v811_v28 }
 0x20d   : > { %v813_v29 = vpop.xlane.xlu0 %812 }
 0x20e   : > { %v814_v30 = vsub.f32 %v809_v27, %v813_v29  ;;  %v826_v37 = vsub.f32 -1e+09, %v813_v29 }
 0x210   : > { %v815_v31 = vmul.f32 1.442695, %v814_v30  ;;  %v827_v40 = vmul.f32 1.442695, %v826_v37 }
 0x212   : > { %1714 = vpow2.f32 %v815_v31 }
 0x213   : > { %1716 = vpow2.f32 %v827_v40 }
 0x21c   : > { %v1715_v32 = vpop.eup %1714 }
 0x21d   : > { %v829_v33 = vsel %vm810_vm7, %v1715_v32, 0.0  ;;  %v2158_v45 = vpop.eup %1716 }
 0x21e   : > { %830 = vadd.xlane.f32.xlu0 %v829_v33  ;;  %v832_v46 = vmul.f32 %v2158_v45, %v825_v44 }
 0x2ab   : > { %v831_v47 = vpop.xlane.xlu0 %830 }
 0x2ac   : > { %v833_v48 = vadd.f32 %v832_v46, %v831_v47 }
 0x2ae   : > { %1718 = vrcp.f32 %v833_v48 }
 0x2b8   : > { %v1719_v49 = vpop.eup %1718 }
 0x2b9   : > { %v835_v50 = vmul.f32 %v1719_v49, %v833_v48 }
 0x2bb   : > { %v836_v51 = vsub.f32 2.0, %v835_v50 }
 0x2bd   : > { %v837_v52 = vmul.f32 %v1719_v49, %v836_v51 }
 0x2bf   : > { %v838_v53 = vmul.f32 %v1715_v32, %v837_v52  ;;  %v839_v15 = vmul.f32 %v2158_v45, %v837_v52 }
 0x2c1   : > { %v1321_v55 = vsel %vm1320_vm10, %v838_v53, 0.0  ;;  %v1291_v56 = vsel %vm1290_vm11, %v838_v53, 0.0  ;;  %v1350_v59 = vsel %vm1349_vm12, %v838_v53, 0.0  ;;  %v1306_v60 = vsel %vm1305_vm13, %v838_v53, 0.0 }
 0x2c2   : > { %v1322_v57 = vsel %vm810_vm7, %v1321_v55, 0.0  ;;  %v1292_v58 = vsel %vm810_vm7, %v1291_v56, 0.0  ;;  %v841_v61 = vsel %vm810_vm7, %v838_v53, 0  ;;  %v1351_v1 = vsel %vm810_vm7, %v1350_v59, 0.0 }
 0x2c3   : > { %1323 = vadd.xlane.f32.xlu0 %v1322_v57  ;;  %1293 = vadd.xlane.f32.xlu1 %v1292_v58  ;;  %v909_v63 = vand.u32 4294901760, %v841_v61  ;;  %v1307_v2 = vsel %vm810_vm7, %v1306_v60, 0.0  ;;  %v1335_v4 = vsel %vm1334_vm14, %v838_v53, 0.0 }
 0x2c4   : > { %v1336_v7 = vsel %vm810_vm7, %v1335_v4, 0.0  ;;  %vm1344_vm7 = vcmp.eq.s32.totalorder %v2137_v18, 3 }
 0x2c5   : > { %v910_v3 = vsub.f32 %v841_v61, %v909_v63 }
 0x2c7   : > { %1352 = vadd.xlane.f32.xlu0 %v1351_v1  ;;  %1308 = vadd.xlane.f32.xlu1 %v1307_v2  ;;  %v911_v6 = vand.u32 4294901760, %v910_v3 }
 0x2c9   : > { %v912_v8 = vsub.f32 %v910_v3, %v911_v6 }
 0x2cb   : > { %1337 = vadd.xlane.f32.xlu1 %v1336_v7  ;;  %v913_v10 = vand.u32 4294901760, %v912_v8 }
 0x2cd   : > { %1608 = vmatmul.mubr.f32.vlgmr.msra.gmra.mrb[0].mxu1 %v913_v10 }
 0x2ce   : > { %1611 = vmatpush3.msra.mxu1 %v924_v9  ;;  %1612 = vmatprep.mubr.msk.f32.mxu1 %vm1886_vm0, %v1885_v0 }
 0x2cf   : > { %1615 = vmatprep.subr.mxu1 %v1885_v0 }
 0x2d5   : > { %1613 = vmatmul.mubr.f32.vlgmr.msra.gmra.mrb[0].mxu1 %v909_v63 }
 0x2d6   : > { %1616 = vmatpush3.msra.mxu1 %v921_v54  ;;  %1617 = vmatprep.mubr.msk.f32.mxu1 %vm1886_vm0, %v1885_v0 }
 0x2d7   : > { %1620 = vmatprep.subr.mxu1 %v1885_v0 }
 0x2dd   : > { %1618 = vmatmul.mubr.f32.vlgmr.msra.gmra.mrb[0].mxu1 %v910_v3 }
 0x2de   : > { %1621 = vmatpush3.msra.mxu1 %v2149_v35  ;;  %1622 = vmatprep.mubr.msk.f32.mxu1 %vm1886_vm0, %v1885_v0 }
 0x2df   : > { %1625 = vmatprep.subr.mxu1 %v1885_v0 }
 0x2e5   : > { %1623 = vmatmul.mubr.f32.vlgmr.msra.gmra.mrb[0].mxu1 %v911_v6 }
 0x2e6   : > { %1626 = vmatpush3.msra.mxu1 %v922_v62  ;;  %1627 = vmatprep.mubr.msk.f32.mxu1 %vm1886_vm0, %v1885_v0 }
 0x2e7   : > { %1630 = vmatprep.subr.mxu1 %v1885_v0 }
 0x2ed   : > { %1628 = vmatmul.mubr.f32.vlgmr.msra.gmra.mrb[0].mxu1 %v909_v63 }
 0x2ee   : > { %1631 = vmatpush3.msra.mxu1 %v2149_v35  ;;  %1632 = vmatprep.mubr.msk.f32.mxu1 %vm1886_vm0, %v1885_v0  ;;  %vm1329_vm0 = vcmp.eq.s32.totalorder %v2137_v18, 2 }
 0x2f5   : > { %1633 = vmatmul.mubr.f32.vlgmr.msra.gmra.mrb[0].mxu1 %v909_v63 }
 0x350   : > { %v1324_v13 = vpop.xlane.xlu0 %1323  ;;  %v1294_v14 = vpop.xlane.xlu1 %1293 }
 0x351   : > { %v1299_v19 = vsel %vm1296_vm15, %v1294_v14, %v839_v15  ;;  %v1332_v17 = vsel %vm1329_vm0, %v1324_v13, 0.0 }
 0x352   : > { %v1303_v21 = vsel %vm1300_vm3, %v1299_v19, 0.0 }
 0x354   : > { %v1309_v0 = vpop.xlane.xlu1 %1308  ;;  %v1353_v22 = vpop.xlane.xlu0 %1352 }
 0x355   : > { %v1314_v20 = vsel %vm1311_vm2, %v1309_v0, %v839_v15  ;;  %v1357_v26 = vsel %vm1355_vm5, %v1353_v22, %v839_v15 }
 0x356   : > { %v1318_v23 = vsel %vm1315_vm4, %v1314_v20, 0.0  ;;  %v1361_v31 = vsel %vm1358_vm8, %v1357_v26, 0.0 }
 0x357   : > { %v1319_v24 = vadd.f32 %v1318_v23, %v1303_v21 }
 0x358   : > { %v1338_v25 = vpop.xlane.xlu1 %1337 }
 0x359   : > { %v1333_v27 = vadd.f32 %v1332_v17, %v1319_v24  ;;  %v1343_v28 = vsel %vm1341_vm6, %v1338_v25, %v839_v15 }
 0x35a   : > { %v1347_v29 = vsel %vm1344_vm7, %v1343_v28, 0.0 }
 0x35b   : > { %v1348_v30 = vadd.f32 %v1347_v29, %v1333_v27 }
 0x35d   : > { %v1362_v32 = vadd.f32 %v1361_v31, %v1348_v30 }
 0x35f   : > { %1363 = vst [vmem:[%s335_s7] sm:$0xff] %v1362_v32 }
 0x3c8   : > { %v1285_v18 = vpop.f32.mrb[0].mxu1 }
 0x3c9   : > { %1289 = vst.msk [vmem:[%s322_s12] sm:$0xff] %vm341_vm1, %v1285_v18  ;;  %v1634_v33 = vpop.f32.mrb[1].mxu1 }
 0x3ca   : > { %1823 = shalt.err (!%p1820_p13)
}
 0x3cb   : > { %s1824_s23 = scalar_lea.hbm %s2208_s9, 128  ;;  %s1828_s6 = scalar_lea.hbm %s2257_s4, 256 }
 0x3cc   : > { %p1825_p11 = scmp.ne.s32.totalorder %s2208_s9, %s1824_s23  ;;  %p1829_p4 = scmp.lt.u32.totalorder %s2208_s9, %s2257_s4 }
 0x3cd   : > { %p1830_p2 = scmp.lt.u32.totalorder %s1828_s6, %s1824_s23  ;;  %p1832_p5 = scmp.lt.u32.totalorder %s1824_s23, %s2208_s9 }
 0x3ce   : > { %p1826_p1 = pnand %p1825_p11, %p2279_p7 }
 0x3cf   : > { %p1831_p10 = por %p1830_p2, %p1829_p4 }
 0x3d0   : > { %p1827_p3 = pneg %p1826_p1 }
 0x3d1   : > { %p1833_p9 = por %p1832_p5, %p1831_p10 }
 0x3d3   : > { %p1834_p6 = pnand %p1833_p9, %p1827_p3 }
 0x3d5   : > { %1837 = shalt.err (!%p1834_p6)
}
 0x3d6   : > { %1661 = dma.vmem_to_hbm [thread:$0]  (%p2279_p7), %s2210_s1, 128, %s2208_s9, %s1365_s16  }
 0x3d7 PF: > { %s1397_s26 = sand.u32 1, %s1868_s18   ;;  %p2280_p12 = scmp.ne.s32.totalorder %s2269_s30, 0 }
 0x3d8   : > { %p2281_p0 = scmp.ge.s32.totalorder %s1880_s21, 2  ;;  %s1398_s13 = scalar_lea.sflag [#allocation4], %s1397_s26 }
 0x3da   : > { %p1674_p8 = pnand %p2281_p0, %p2280_p12 }
 0x3dc   : > { %1863 = dma.done.wait (!%p1674_p8), %s1398_s13, 128  }
 0x3dd   : > { %1865 = vsyncadd (!%p1674_p8), %s1398_s13, 4294967168  ;;  %s2282_s7 = sld [smem:[#allocation12_spill]]  ;;  %s2283_s20 = sld [smem:[#allocation13_spill]] }
 0x3de   : > { %p22_p13 = scmp.ge.s32.totalorder %s1944_s24, 4   ;;  %s2284_s18 = smov %s1872_s19 }
 0x3df   : > { %s2286_s21 = smov %s1944_s24 }
 0x3e0   :  { %24 = sbr.rel (!%p22_p13) target bundleno = 9 (0x9), region = 120 }
 0x3e3   : > { %s2285_s19 = smov %s2282_s7 }
 0x3e7   :  { %1410 = vsyncpa [#allocation3], 1 }
 0x3e8   :  { %1412 = vsyncpa [#allocation3 + $0x1], 1 }
 0x3e9   :  { %1413 = vsyncpa [#allocation6], 1 }
 0x3ea   :  { %1415 = vsyncpa [#allocation6 + $0x1], 1 }
 0x3eb   :  { %1416 = vsyncpa [#allocation4], 1 }
 0x3ec   :  { %1418 = vsyncpa [#allocation4 + $0x1], 1 }

</bundles_post_ra>
